<compile_context>
chip_gen: v6e
topology: v6e:2x2x1
jax: 0.10.0
libtpu: 0.0.40
codegen_flags: <defaults>
</compile_context>

<pallas_src>
import math

import jax
import jax.numpy as jnp
from jax.experimental import pallas as pl
from jax.experimental.pallas import tpu as pltpu


def _zero_kernel(x_ref, o_ref):
    # Elementwise multiply by 0.0 (keeps torch's x.mul(0.0) NaN/Inf semantics).
    o_ref[...] = x_ref[...] * jnp.asarray(0.0, dtype=x_ref.dtype)


_COMPILER_PARAMS = pltpu.CompilerParams(
    dimension_semantics=("parallel",),
    vmem_limit_bytes=32 * 1024 * 1024,
)


def zero_forward(x):
    """Pallas implementation of Zero.forward: returns x * 0.0."""
    orig_shape = x.shape
    dtype = x.dtype
    n = math.prod(orig_shape) if orig_shape else 1

    if n == 0:
        return jnp.zeros(orig_shape, dtype=dtype)

    itemsize = jnp.dtype(dtype).itemsize
    sublane = max(8, 32 // itemsize)  # 8 for f32, 16 for bf16, 32 for int8/fp8
    flat = x.reshape(-1)

    if n % 128 == 0:
        # Fast path: lane-dense 2D view, no padding / extra HBM copies.
        cols = 128
        while cols * 2 <= 1024 and n % (cols * 2) == 0:
            cols *= 2
        rows = n // cols

        # Target ~4 MiB blocks; with in+out double-buffered that's ~16 MiB VMEM.
        target_block_bytes = 4 * 1024 * 1024
        tile_rows = max(1, target_block_bytes // (cols * itemsize))
        if tile_rows >= rows:
            tile_rows = rows  # single block covering the whole (reshaped) array
        else:
            tile_rows = max(sublane, (tile_rows // sublane) * sublane)

        x2d = flat.reshape(rows, cols)
        grid = (pl.cdiv(rows, tile_rows),)

        out2d = pl.pallas_call(
            _zero_kernel,
            out_shape=jax.ShapeDtypeStruct((rows, cols), dtype),
            grid=grid,
            in_specs=[pl.BlockSpec((tile_rows, cols), lambda i: (i, 0))],
            out_specs=pl.BlockSpec((tile_rows, cols), lambda i: (i, 0)),
            compiler_params=_COMPILER_PARAMS,
        )(x2d)
        return out2d.reshape(orig_shape)

    # Ragged fallback (element count not a multiple of 128): run the whole
    # array as a single full-extent block (allowed regardless of (8,128)
    # divisibility). Intended for small ragged inputs.
    # TODO(synk): tile the 128-aligned prefix + remainder for very large ragged inputs.
    x2d = flat.reshape(1, n)
    out2d = pl.pallas_call(
        _zero_kernel,
        out_shape=jax.ShapeDtypeStruct((1, n), dtype),
        grid=(1,),
        in_specs=[pl.BlockSpec((1, n), lambda i: (0, 0))],
        out_specs=pl.BlockSpec((1, n), lambda i: (0, 0)),
        compiler_params=_COMPILER_PARAMS,
    )(x2d)
    return out2d.reshape(orig_shape)


if __name__ == "__main__":
    key = jax.random.PRNGKey(0)
    # Small NCHW input consistent with a conv-style search-space module.
    x = jax.random.normal(key, (2, 4, 16, 16), dtype=jnp.float32)

    y = zero_forward(x)
    y = jax.block_until_ready(y)

    expected = x * 0.0
    assert y.shape == x.shape and y.dtype == x.dtype
    assert jnp.allclose(y, expected)

    print("KERNEL_OK")
</pallas_src>

<mosaic_0001>
module attributes {stable_mosaic.version = 11 : i64} {
  func.func @_zero_kernel(%arg0: i32, %arg1: memref<2x1024xf32, #tpu.memory_space<vmem>>, %arg2: memref<2x1024xf32, #tpu.memory_space<vmem>>) attributes {dimension_semantics = [#tpu.dimension_semantics<parallel>], iteration_bounds = array<i64: 1>, scalar_prefetch = 0 : i64, scratch_operands = 0 : i64, tpu.core_type = #tpu.core_type<tc>, window_params = [{transform_indices = @transform_0, window_bounds = array<i64: 2, 1024>}, {transform_indices = @transform_1, window_bounds = array<i64: 2, 1024>}]} {
    %c0 = arith.constant 0 : index
    %c0_0 = arith.constant 0 : index
    %0 = vector.load %arg1[%c0, %c0_0] : memref<2x1024xf32, #tpu.memory_space<vmem>>, vector<2x1024xf32>
    %cst = arith.constant 0.000000e+00 : f32
    %1 = vector.broadcast %cst : f32 to vector<2x1024xf32>
    %2 = arith.mulf %0, %1 : vector<2x1024xf32>
    %c0_1 = arith.constant 0 : index
    %c0_2 = arith.constant 0 : index
    %3 = vector.load %arg2[%c0_1, %c0_2] : memref<2x1024xf32, #tpu.memory_space<vmem>>, vector<2x1024xf32>
    tpu.vector_store %arg2[%c0_1, %c0_2], %2 {strides = array<i32>} : memref<2x1024xf32, #tpu.memory_space<vmem>>, vector<2x1024xf32>,
    return
  }
  func.func @transform_0(%arg0: i32) -> (i32, i32) {
    %c0_i32 = arith.constant 0 : i32
    %c0_i32_0 = arith.constant 0 : i32
    return %arg0, %c0_i32 : i32, i32
  }
  func.func @transform_1(%arg0: i32) -> (i32, i32) {
    %c0_i32 = arith.constant 0 : i32
    %c0_i32_0 = arith.constant 0 : i32
    return %arg0, %c0_i32 : i32, i32
  }
}

</mosaic_0001>

<bundles_post_ra>
// kernel: tpu_custom_call.1
= control target key start
LH: loop header
LB: loop body
LE: loop exit
PB: predicated region body
PF: predicated region fallthrough
CT: control target
= control target key end

     0   :  { %6 = vsyncpa [#allocation3], 0  ;;  %s106_s0 = inlined_call_operand.hbm [shape: f32[2,1024], index: 0, kind: input, shape index: {}]   ;;  %s107_s1 = inlined_call_operand.hbm [shape: f32[2,1024], index: 1, kind: output, shape index: {}]  }
   0x1   :  { %7 = vsyncpa [#allocation4], 0  ;;  %s88_s6 = smov [#allocation2]  }
   0x2   :  { %s14_s7 = sshll.u32 %s88_s6, 4  ;;  %s15_s7 = int_to_ptr.vmem [resolvable:$true] %s14_s7 }
   0x3   :  { %s52_s8 = scalar_lea.vmem %s15_s7, 256  ;;  %p57_p1 = scmp.lt.s32.totalorder %s15_s7, %s15_s7 }
   0x4   :  { %p53_p0 = scmp.ne.s32.totalorder %s15_s7, %s52_s8  ;;  %p58_p2 = scmp.lt.s32.totalorder %s52_s8, %s52_s8 }
   0x6   :  { %p59_p3 = por %p58_p2, %p57_p1 }
   0x8   :  { %p60_p4 = pnand %p59_p3, %p53_p0 }
   0xa   :  { %63 = shalt.err (!%p60_p4)
}
   0xb   :  { %17 = dma.hbm_to_vmem [thread:$0]  %s106_s0, 256, %s15_s7, [#allocation3]  }
   0xc   :  { %84 = dma.done.wait [#allocation3], 256  }
   0xd   :  { %85 = vsyncadd [#allocation3], 4294967040  ;;  %s89_s11 = smov [#allocation5]   ;;  %v21_v0 = vld [vmem:[#allocation2] sm:$0xff]  ;;  %v22_v1 = vld [vmem:[#allocation2 + $0x8] sm:$0xff] }
   0xe   :  { %s33_s12 = sshll.u32 %s89_s11, 4  ;;  %v23_v2 = vmul.f32 0.0, %v21_v0  ;;  %v24_v3 = vmul.f32 0.0, %v22_v1  ;;  %s34_s12 = int_to_ptr.vmem [resolvable:$true] %s33_s12 }
   0xf   :  { %s64_s13 = scalar_lea.vmem %s34_s12, 256  ;;  %p69_p6 = scmp.lt.s32.totalorder %s34_s12, %s34_s12 }
  0x10   :  { %25 = vst [vmem:[#allocation5] sm:$0xff] %v23_v2  ;;  %26 = vst [vmem:[#allocation5 + $0x8] sm:$0xff] %v24_v3  ;;  %p65_p5 = scmp.ne.s32.totalorder %s34_s12, %s64_s13  ;;  %p70_p7 = scmp.lt.s32.totalorder %s64_s13, %s64_s13 }
  0x12   :  { %p71_p8 = por %p70_p7, %p69_p6 }
  0x14   :  { %p72_p9 = pnand %p71_p8, %p65_p5 }
  0x16   :  { %75 = shalt.err (!%p72_p9)
}
  0x17   :  { %36 = dma.vmem_to_hbm [thread:$0]  %s34_s12, 256, %s107_s1, [#allocation4]  }
  0x18   :  { %86 = dma.done.wait [#allocation4], 256  }
  0x19   :  { %87 = vsyncadd [#allocation4], 4294967040 }
  0x1a   :  { %40 = vsyncpa [#allocation3], 1 }
  0x1b   :  { %41 = vsyncpa [#allocation4], 1 }

</bundles_post_ra>
